<compile_context>
chip_gen: v7x
topology: tpu7x:2x2x1
jax: 0.10.0
libtpu: 0.0.40
codegen_flags: <defaults>
</compile_context>

<pallas_src>
import numpy as np

import jax
import jax.numpy as jnp
from jax.experimental import pallas as pl
from jax.experimental.pallas import tpu as pltpu

# Small, shape-consistent synthetic config (module uses embedding_dim=128,
# max_seq_length=512; seq_length comes from the tokenized batch -> pick 16).
MAX_SEQ_LENGTH = 512
EMBEDDING_DIM = 128
SEQ_LENGTH = 16


def _posit_embed_dma_kernel(emb_hbm, out_hbm, sem):
    """Single HBM->HBM DMA of rows [0, seq_length) of the table.

    emb_hbm : HBM ref (max_seq_length, embedding_dim), table weight
    out_hbm : HBM ref (1, seq_length, embedding_dim), kernel output
    sem     : DMA completion semaphore (scratch)
    """
    seq_length = out_hbm.shape[1]
    cp = pltpu.make_async_copy(
        emb_hbm.at[pl.ds(0, seq_length), :],   # (seq_length, dim) source view
        out_hbm.at[0],                         # (seq_length, dim) dest view
        sem,
    )
    cp.start()
    cp.wait()


def _check_ids_are_arange(ids):
    """Host-side guard: the contiguous-slice fast path assumes arange ids."""
    try:
        ids_np = np.asarray(jax.device_get(ids))
    except Exception:
        # Traced value (inside jit) -- skip the concrete check.
        return
    if not np.array_equal(ids_np, np.arange(ids_np.shape[0], dtype=ids_np.dtype)):
        raise ValueError(
            "positional_embed fast path requires posit_embed_init == "
            "arange(0, seq_length); got non-arange position ids.")


def positional_embed(posit_embed_init, posit_embedding_weight):
    """JAX wrapper equivalent to Positional_embed.forward().

    `posit_embed_init` is arange(0, seq_length) by module construction, so
    the embedding lookup collapses to a contiguous slice of the first
    seq_length rows, done as one direct HBM->HBM DMA.
    Returns (1, seq_length, embedding_dim).
    """
    seq_length = posit_embed_init.shape[0]
    max_seq, dim = posit_embedding_weight.shape
    assert seq_length <= max_seq, (
        f"seq_length={seq_length} exceeds max_seq_length={max_seq}")
    _check_ids_are_arange(posit_embed_init)

    itemsize = jnp.dtype(posit_embedding_weight.dtype).itemsize
    out = pl.pallas_call(
        _posit_embed_dma_kernel,
        out_shape=jax.ShapeDtypeStruct((1, seq_length, dim),
                                       posit_embedding_weight.dtype),
        # No grid / no block tiling: both operands stay in HBM, the kernel
        # body is a single DMA descriptor.
        in_specs=[pl.BlockSpec(memory_space=pl.ANY)],
        out_specs=pl.BlockSpec(memory_space=pl.ANY),
        scratch_shapes=[pltpu.SemaphoreType.DMA(())],
        cost_estimate=pl.CostEstimate(
            flops=0,
            transcendentals=0,
            bytes_accessed=2 * seq_length * dim * itemsize),
    )(posit_embedding_weight)

    return out


if __name__ == "__main__":
    key = jax.random.PRNGKey(0)

    # nn.Embedding(max_seq_length, embedding_dim) weight ~ N(0, 1),
    # deterministic init.
    posit_embedding_weight = jax.random.normal(
        key, (MAX_SEQ_LENGTH, EMBEDDING_DIM), dtype=jnp.float32)

    # self.posit_embed_init = torch.arange(0, seq_length)
    posit_embed_init = jnp.arange(0, SEQ_LENGTH, dtype=jnp.int32)

    out = positional_embed(posit_embed_init, posit_embedding_weight)
    out = jax.block_until_ready(out)

    # Reference check against plain-JAX embedding lookup + unsqueeze(0).
    expected = posit_embedding_weight[posit_embed_init][None, :, :]
    assert out.shape == (1, SEQ_LENGTH, EMBEDDING_DIM), out.shape
    assert out.dtype == jnp.float32
    assert jnp.array_equal(out, expected), "mismatch vs reference embedding lookup"

    print("KERNEL_OK")
</pallas_src>

<mosaic_0001>
module attributes {stable_mosaic.version = 11 : i64} {
  func.func @_posit_embed_dma_kernel(%arg0: memref<512x128xf32, #tpu.memory_space<any>>, %arg1: memref<1x16x128xf32, #tpu.memory_space<any>>, %arg2: memref<!tpu.dma_semaphore, #tpu.memory_space<semaphore_mem>>) attributes {dimension_semantics = [], scalar_prefetch = 0 : i64, scratch_operands = 1 : i64, tpu.core_type = #tpu.core_type<tc>} {
    %c0_i32 = arith.constant 0 : i32
    %c0_i32_0 = arith.constant 0 : i32
    %c0_i32_1 = arith.constant 0 : i32
    %0 = tpu.memref_slice %arg0[%c0_i32_0, %c0_i32_1] : memref<512x128xf32, #tpu.memory_space<any>> -> memref<16x128xf32, #tpu.memory_space<any>>
    %c0_i32_2 = arith.constant 0 : i32
    %c0_i32_3 = arith.constant 0 : i32
    %1 = tpu.memref_slice %arg1[%c0_i32, %c0_i32_2, %c0_i32_3] : memref<1x16x128xf32, #tpu.memory_space<any>> -> memref<1x16x128xf32, #tpu.memory_space<any>>
    %2 = tpu.memref_squeeze %1 : memref<1x16x128xf32, #tpu.memory_space<any>> -> memref<16x128xf32, #tpu.memory_space<any>>
    tpu.enqueue_dma source(%0 : memref<16x128xf32, #tpu.memory_space<any>>) target(%2 : memref<16x128xf32, #tpu.memory_space<any>>) target_semaphore(%arg2 : memref<!tpu.dma_semaphore, #tpu.memory_space<semaphore_mem>>)
    %c0_i32_4 = arith.constant 0 : i32
    %c0_i32_5 = arith.constant 0 : i32
    %c0_i32_6 = arith.constant 0 : i32
    %3 = tpu.memref_slice %arg0[%c0_i32_5, %c0_i32_6] : memref<512x128xf32, #tpu.memory_space<any>> -> memref<16x128xf32, #tpu.memory_space<any>>
    %c0_i32_7 = arith.constant 0 : i32
    %c0_i32_8 = arith.constant 0 : i32
    %4 = tpu.memref_slice %arg1[%c0_i32_4, %c0_i32_7, %c0_i32_8] : memref<1x16x128xf32, #tpu.memory_space<any>> -> memref<1x16x128xf32, #tpu.memory_space<any>>
    %5 = tpu.memref_squeeze %4 : memref<1x16x128xf32, #tpu.memory_space<any>> -> memref<16x128xf32, #tpu.memory_space<any>>
    tpu.wait_dma2 semaphore(%arg2 : memref<!tpu.dma_semaphore, #tpu.memory_space<semaphore_mem>>) src(%3 : memref<16x128xf32, #tpu.memory_space<any>>) dst(%5 : memref<16x128xf32, #tpu.memory_space<any>>)
    return
  }
}

</mosaic_0001>

<bundles_post_ra>
// kernel: tpu_custom_call.1
= control target key start
LH: loop header
LB: loop body
LE: loop exit
PB: predicated region body
PF: predicated region fallthrough
CT: control target
= control target key end

     0   :  { %s34_s6 = smov [#allocation2]   ;;  %s35_s7 = smov [#allocation3]   ;;  %s53_s0 = inlined_call_operand.hbm [shape: f32[512,128], index: 0, kind: input, shape index: {}]   ;;  %s54_s1 = inlined_call_operand.hbm [shape: f32[1,16,128], index: 1, kind: output, shape index: {}]  }
   0x1   :  { %s36_s8 = smov 0  }
   0x2   :  { %18 = dma.general %s53_s0, 256, %s54_s1, %s34_s6, %s35_s7, [#allocation4], %s36_s8, 0  }
   0x3   :  { %32 = dma.done.wait [#allocation2], 256 }
   0x4   :  { %33 = vsyncadd [#allocation2], 4294967040 }
   0x5   :  { %22 = vsyncmov [#allocation2] }
   0x8   :  { %s23_s13 = vpop.sfrf %22 }
   0x9   :  { %p28_p0 = scmp.ne.s32.totalorder %s23_s13, 0 }
   0xb   :  { %27 = shalt.err (%p28_p0)  }

</bundles_post_ra>
